<compile_context>
chip_gen: v7x
topology: tpu7x:2x2x1
jax: 0.10.0
libtpu: 0.0.40
codegen_flags: <defaults>
</compile_context>

<pallas_src>
import jax
import jax.numpy as jnp
from jax.experimental import pallas as pl
from jax.experimental.pallas import tpu as pltpu


def policy_kernel(x_ref, w1_ref, b1_ref, w2t_ref, b2_ref, out_ref):
    # Per-grid-step shapes:
    #   x_ref   : [1, B, 4]    one rollout's observations
    #   w1_ref  : [4, 128]     fc1 weight as [in, out] (lane-dense)
    #   b1_ref  : [1, 128]
    #   w2t_ref : [2, 128]     fc2 weight in torch-native [out, in] layout
    #   b2_ref  : [1, 2]
    #   out_ref : [1, B, 2]
    x = x_ref[0]                                   # [B, 4]
    w1 = w1_ref[...]                               # [4, 128]

    # ---- fc1 + bias + ReLU: K=4 -> 4 unrolled VPU broadcast-FMAs (no MXU) ---
    h = x[:, 0:1] * w1[0:1, :]
    h = h + x[:, 1:2] * w1[1:2, :]
    h = h + x[:, 2:3] * w1[2:3, :]
    h = h + x[:, 3:4] * w1[3:4, :]
    h = jnp.maximum(h + b1_ref[...], 0.0)          # [B, 128]

    # ---- fc2: N=2 via two cross-lane (XLU) reductions on lane-dense w2t -----
    w2t = w2t_ref[...]                             # [2, 128]
    s0 = jnp.sum(h * w2t[0:1, :], axis=-1, keepdims=True)   # [B, 1]
    s1 = jnp.sum(h * w2t[1:2, :], axis=-1, keepdims=True)   # [B, 1]
    # Assemble [B, 2] logits with a pure-VPU select (no concat / MXU needed).
    col = jax.lax.broadcasted_iota(jnp.int32, (h.shape[0], 2), 1)
    logits = jnp.where(col == 0, s0, s1) + b2_ref[...]       # [B, 2]

    # ---- softmax over dim 0 (batch axis), matching F.softmax(x, dim=0) ------
    m = jnp.max(logits, axis=0, keepdims=True)               # [1, 2]
    e = jnp.exp(logits - m)                                  # [B, 2]
    inv = pl.reciprocal(jnp.sum(e, axis=0, keepdims=True), approx=False)
    out_ref[0, :, :] = e * inv


def policy_forward(x, w1, b1, w2t, b2):
    """Forward pass of `Policy`.

    x    : [B, 4]  (single rollout, identical to the PyTorch module), or
           [E, B, 4] (E independent rollouts batched into one pallas_call).
    w1   : [4, 128]  (= fc1.weight.T),  b1 : [1, 128]
    w2t  : [2, 128]  (= fc2.weight, torch [out, in] layout),  b2 : [1, 2]
    Returns [B, 2] or [E, B, 2] probabilities (softmax over the B axis).
    """
    squeeze = False
    if x.ndim == 2:
        x = x[None]            # [1, B, 4]
        squeeze = True
    E, B, F = x.shape
    assert F == 4, "Policy.fc1 expects 4 input features"

    out = pl.pallas_call(
        policy_kernel,
        out_shape=jax.ShapeDtypeStruct((E, B, 2), jnp.float32),
        grid=(E,),
        in_specs=[
            pl.BlockSpec((1, B, F), lambda e: (e, 0, 0)),   # x : one rollout/step
            pl.BlockSpec((4, 128), lambda e: (0, 0)),       # w1 (same block every step)
            pl.BlockSpec((1, 128), lambda e: (0, 0)),       # b1
            pl.BlockSpec((2, 128), lambda e: (0, 0)),       # w2t (lane-dense)
            pl.BlockSpec((1, 2), lambda e: (0, 0)),         # b2
        ],
        out_specs=pl.BlockSpec((1, B, 2), lambda e: (e, 0, 0)),
        compiler_params=pltpu.CompilerParams(
            # Rollouts are independent -> shard the grid across TensorCores
            # (2x on v7x; no-op on v5e/v6e).
            dimension_semantics=("parallel",),
        ),
    )(x, w1, b1, w2t, b2)

    return out[0] if squeeze else out


def init_params(key):
    # Deterministic init mimicking torch.nn.Linear default:
    # U(-1/sqrt(fan_in), 1/sqrt(fan_in)) for both weight and bias.
    k1, k2, k3, k4 = jax.random.split(key, 4)
    bnd1 = 1.0 / jnp.sqrt(4.0)
    bnd2 = 1.0 / jnp.sqrt(128.0)
    w1 = jax.random.uniform(k1, (4, 128), jnp.float32, -bnd1, bnd1)   # fc1.weight.T
    b1 = jax.random.uniform(k2, (1, 128), jnp.float32, -bnd1, bnd1)
    w2t = jax.random.uniform(k3, (2, 128), jnp.float32, -bnd2, bnd2)  # fc2.weight
    b2 = jax.random.uniform(k4, (1, 2), jnp.float32, -bnd2, bnd2)
    return w1, b1, w2t, b2


def reference_forward(x, w1, b1, w2t, b2):
    h = jnp.maximum(x @ w1 + b1, 0.0)
    logits = h @ w2t.T + b2
    return jax.nn.softmax(logits, axis=0)   # dim=0, as in the PyTorch module


if __name__ == "__main__":
    key = jax.random.PRNGKey(0)
    kx, kp = jax.random.split(key)

    B = 8  # small batch; CartPole observation dim = 4
    x = jax.random.normal(kx, (B, 4), jnp.float32)
    w1, b1, w2t, b2 = init_params(kp)

    # Single-rollout call: exactly the PyTorch module's forward.
    out = jax.block_until_ready(policy_forward(x, w1, b1, w2t, b2))
    ref = reference_forward(x, w1, b1, w2t, b2)
    assert out.shape == (B, 2)
    assert jnp.allclose(out, ref, atol=1e-5, rtol=1e-5), "mismatch vs reference"
    assert jnp.allclose(jnp.sum(out, axis=0), jnp.ones((2,)), atol=1e-5)

    # Batched rollouts: E independent policy evaluations in one pallas_call
    # (amortizes launch overhead; "parallel" grid axis uses both v7x cores).
    E = 4
    xb = jax.random.normal(jax.random.PRNGKey(1), (E, B, 4), jnp.float32)
    outb = jax.block_until_ready(policy_forward(xb, w1, b1, w2t, b2))
    refb = jax.vmap(lambda xe: reference_forward(xe, w1, b1, w2t, b2))(xb)
    assert outb.shape == (E, B, 2)
    assert jnp.allclose(outb, refb, atol=1e-5, rtol=1e-5), "batched mismatch"

    # TODO(synk): train_net / Adam optimizer / put_data bookkeeping are
    # training-side state, not part of the forward pass, and are not kernelized.
    print("KERNEL_OK")
</pallas_src>

<mosaic_0001>
module attributes {stable_mosaic.version = 11 : i64} {
  func.func @policy_kernel(%arg0: i32, %arg1: memref<1x8x4xf32, #tpu.memory_space<vmem>>, %arg2: memref<4x128xf32, #tpu.memory_space<vmem>>, %arg3: memref<1x128xf32, #tpu.memory_space<vmem>>, %arg4: memref<2x128xf32, #tpu.memory_space<vmem>>, %arg5: memref<1x2xf32, #tpu.memory_space<vmem>>, %arg6: memref<1x8x2xf32, #tpu.memory_space<vmem>>) attributes {dimension_semantics = [#tpu.dimension_semantics<parallel>], iteration_bounds = array<i64: 1>, scalar_prefetch = 0 : i64, scratch_operands = 0 : i64, tpu.core_type = #tpu.core_type<tc>, window_params = [{transform_indices = @transform_0, window_bounds = array<i64: 1, 8, 4>}, {pipeline_mode = #tpu.pipeline_mode<synchronous>, transform_indices = @transform_1, window_bounds = array<i64: 4, 128>}, {pipeline_mode = #tpu.pipeline_mode<synchronous>, transform_indices = @transform_2, window_bounds = array<i64: 1, 128>}, {pipeline_mode = #tpu.pipeline_mode<synchronous>, transform_indices = @transform_3, window_bounds = array<i64: 2, 128>}, {pipeline_mode = #tpu.pipeline_mode<synchronous>, transform_indices = @transform_4, window_bounds = array<i64: 1, 2>}, {transform_indices = @transform_5, window_bounds = array<i64: 1, 8, 2>}]} {
    %c0 = arith.constant 0 : index
    %c0_0 = arith.constant 0 : index
    %c0_1 = arith.constant 0 : index
    %0 = vector.load %arg1[%c0, %c0_0, %c0_1] : memref<1x8x4xf32, #tpu.memory_space<vmem>>, vector<1x8x4xf32>
    %1 = vector.shape_cast %0 : vector<1x8x4xf32> to vector<8x4xf32>
    %c0_2 = arith.constant 0 : index
    %c0_3 = arith.constant 0 : index
    %2 = vector.load %arg2[%c0_2, %c0_3] : memref<4x128xf32, #tpu.memory_space<vmem>>, vector<4x128xf32>
    %3 = vector.extract_strided_slice %1 {offsets = [0, 0], sizes = [8, 1], strides = [1, 1]} : vector<8x4xf32> to vector<8x1xf32>
    %4 = vector.extract_strided_slice %2 {offsets = [0, 0], sizes = [1, 128], strides = [1, 1]} : vector<4x128xf32> to vector<1x128xf32>
    %5 = vector.broadcast %3 : vector<8x1xf32> to vector<8x128xf32>
    %6 = vector.broadcast %4 : vector<1x128xf32> to vector<8x128xf32>
    %7 = arith.mulf %5, %6 : vector<8x128xf32>
    %8 = vector.extract_strided_slice %1 {offsets = [0, 1], sizes = [8, 1], strides = [1, 1]} : vector<8x4xf32> to vector<8x1xf32>
    %9 = vector.extract_strided_slice %2 {offsets = [1, 0], sizes = [1, 128], strides = [1, 1]} : vector<4x128xf32> to vector<1x128xf32>
    %10 = vector.broadcast %8 : vector<8x1xf32> to vector<8x128xf32>
    %11 = vector.broadcast %9 : vector<1x128xf32> to vector<8x128xf32>
    %12 = arith.mulf %10, %11 : vector<8x128xf32>
    %13 = arith.addf %7, %12 : vector<8x128xf32>
    %14 = vector.extract_strided_slice %1 {offsets = [0, 2], sizes = [8, 1], strides = [1, 1]} : vector<8x4xf32> to vector<8x1xf32>
    %15 = vector.extract_strided_slice %2 {offsets = [2, 0], sizes = [1, 128], strides = [1, 1]} : vector<4x128xf32> to vector<1x128xf32>
    %16 = vector.broadcast %14 : vector<8x1xf32> to vector<8x128xf32>
    %17 = vector.broadcast %15 : vector<1x128xf32> to vector<8x128xf32>
    %18 = arith.mulf %16, %17 : vector<8x128xf32>
    %19 = arith.addf %13, %18 : vector<8x128xf32>
    %20 = vector.extract_strided_slice %1 {offsets = [0, 3], sizes = [8, 1], strides = [1, 1]} : vector<8x4xf32> to vector<8x1xf32>
    %21 = vector.extract_strided_slice %2 {offsets = [3, 0], sizes = [1, 128], strides = [1, 1]} : vector<4x128xf32> to vector<1x128xf32>
    %22 = vector.broadcast %20 : vector<8x1xf32> to vector<8x128xf32>
    %23 = vector.broadcast %21 : vector<1x128xf32> to vector<8x128xf32>
    %24 = arith.mulf %22, %23 : vector<8x128xf32>
    %25 = arith.addf %19, %24 : vector<8x128xf32>
    %c0_4 = arith.constant 0 : index
    %c0_5 = arith.constant 0 : index
    %26 = vector.load %arg3[%c0_4, %c0_5] : memref<1x128xf32, #tpu.memory_space<vmem>>, vector<1x128xf32>
    %27 = vector.broadcast %26 : vector<1x128xf32> to vector<8x128xf32>
    %28 = arith.addf %25, %27 : vector<8x128xf32>
    %cst = arith.constant 0.000000e+00 : f32
    %29 = vector.broadcast %cst : f32 to vector<8x128xf32>
    %30 = arith.maximumf %28, %29 : vector<8x128xf32>
    %c0_6 = arith.constant 0 : index
    %c0_7 = arith.constant 0 : index
    %31 = vector.load %arg4[%c0_6, %c0_7] : memref<2x128xf32, #tpu.memory_space<vmem>>, vector<2x128xf32>
    %32 = vector.extract_strided_slice %31 {offsets = [0, 0], sizes = [1, 128], strides = [1, 1]} : vector<2x128xf32> to vector<1x128xf32>
    %33 = vector.broadcast %32 : vector<1x128xf32> to vector<8x128xf32>
    %34 = arith.mulf %30, %33 : vector<8x128xf32>
    %cst_8 = arith.constant dense<0.000000e+00> : vector<8xf32>
    %35 = vector.multi_reduction <add>, %34, %cst_8 [1] : vector<8x128xf32> to vector<8xf32>
    %36 = vector.shape_cast %35 : vector<8xf32> to vector<8x1xf32>
    %37 = vector.extract_strided_slice %31 {offsets = [1, 0], sizes = [1, 128], strides = [1, 1]} : vector<2x128xf32> to vector<1x128xf32>
    %38 = vector.broadcast %37 : vector<1x128xf32> to vector<8x128xf32>
    %39 = arith.mulf %30, %38 : vector<8x128xf32>
    %cst_9 = arith.constant dense<0.000000e+00> : vector<8xf32>
    %40 = vector.multi_reduction <add>, %39, %cst_9 [1] : vector<8x128xf32> to vector<8xf32>
    %41 = vector.shape_cast %40 : vector<8xf32> to vector<8x1xf32>
    %42 = tpu.iota {dimensions = array<i32: 1>} : vector<8x2xi32>
    %c0_i32 = arith.constant 0 : i32
    %43 = vector.broadcast %c0_i32 : i32 to vector<8x2xi32>
    %44 = arith.cmpi eq, %42, %43 : vector<8x2xi32>
    %45 = vector.shape_cast %36 : vector<8x1xf32> to vector<8x1xf32>
    %46 = vector.broadcast %45 : vector<8x1xf32> to vector<8x2xf32>
    %47 = vector.shape_cast %41 : vector<8x1xf32> to vector<8x1xf32>
    %48 = vector.broadcast %47 : vector<8x1xf32> to vector<8x2xf32>
    %49 = arith.select %44, %46, %48 : vector<8x2xi1>, vector<8x2xf32>
    %c0_10 = arith.constant 0 : index
    %c0_11 = arith.constant 0 : index
    %50 = vector.load %arg5[%c0_10, %c0_11] : memref<1x2xf32, #tpu.memory_space<vmem>>, vector<1x2xf32>
    %51 = vector.broadcast %50 : vector<1x2xf32> to vector<8x2xf32>
    %52 = arith.addf %49, %51 : vector<8x2xf32>
    %cst_12 = arith.constant dense<0xFF800000> : vector<2xf32>
    %53 = vector.multi_reduction <maximumf>, %52, %cst_12 [0] : vector<8x2xf32> to vector<2xf32>
    %54 = vector.shape_cast %53 : vector<2xf32> to vector<1x2xf32>
    %55 = vector.broadcast %54 : vector<1x2xf32> to vector<8x2xf32>
    %56 = arith.subf %52, %55 : vector<8x2xf32>
    %57 = math.exp %56 : vector<8x2xf32>
    %cst_13 = arith.constant dense<0.000000e+00> : vector<2xf32>
    %58 = vector.multi_reduction <add>, %57, %cst_13 [0] : vector<8x2xf32> to vector<2xf32>
    %59 = vector.shape_cast %58 : vector<2xf32> to vector<1x2xf32>
    %60 = tpu.reciprocal %59 : vector<1x2xf32> -> vector<1x2xf32>
    %61 = vector.broadcast %60 : vector<1x2xf32> to vector<8x2xf32>
    %62 = arith.mulf %57, %61 : vector<8x2xf32>
    %c0_14 = arith.constant 0 : index
    %c0_15 = arith.constant 0 : index
    %c0_16 = arith.constant 0 : index
    %63 = vector.load %arg6[%c0_14, %c0_15, %c0_16] : memref<1x8x2xf32, #tpu.memory_space<vmem>>, vector<1x8x2xf32>
    %64 = vector.shape_cast %63 : vector<1x8x2xf32> to vector<8x2xf32>
    %65 = vector.shape_cast %62 : vector<8x2xf32> to vector<1x8x2xf32>
    tpu.vector_store %arg6[%c0_14, %c0_15, %c0_16], %65 {strides = array<i32>} : memref<1x8x2xf32, #tpu.memory_space<vmem>>, vector<1x8x2xf32>,
    return
  }
  func.func @transform_0(%arg0: i32) -> (i32, i32, i32) {
    %c0_i32 = arith.constant 0 : i32
    %c0_i32_0 = arith.constant 0 : i32
    %c0_i32_1 = arith.constant 0 : i32
    return %arg0, %c0_i32, %c0_i32_0 : i32, i32, i32
  }
  func.func @transform_1(%arg0: i32) -> (i32, i32) {
    %c0_i32 = arith.constant 0 : i32
    %c0_i32_0 = arith.constant 0 : i32
    %c0_i32_1 = arith.constant 0 : i32
    return %c0_i32, %c0_i32_0 : i32, i32
  }
  func.func @transform_2(%arg0: i32) -> (i32, i32) {
    %c0_i32 = arith.constant 0 : i32
    %c0_i32_0 = arith.constant 0 : i32
    %c0_i32_1 = arith.constant 0 : i32
    return %c0_i32, %c0_i32_0 : i32, i32
  }
  func.func @transform_3(%arg0: i32) -> (i32, i32) {
    %c0_i32 = arith.constant 0 : i32
    %c0_i32_0 = arith.constant 0 : i32
    %c0_i32_1 = arith.constant 0 : i32
    return %c0_i32, %c0_i32_0 : i32, i32
  }
  func.func @transform_4(%arg0: i32) -> (i32, i32) {
    %c0_i32 = arith.constant 0 : i32
    %c0_i32_0 = arith.constant 0 : i32
    %c0_i32_1 = arith.constant 0 : i32
    return %c0_i32, %c0_i32_0 : i32, i32
  }
  func.func @transform_5(%arg0: i32) -> (i32, i32, i32) {
    %c0_i32 = arith.constant 0 : i32
    %c0_i32_0 = arith.constant 0 : i32
    %c0_i32_1 = arith.constant 0 : i32
    return %arg0, %c0_i32, %c0_i32_0 : i32, i32, i32
  }
}

</mosaic_0001>

<bundles_post_ra>
// kernel: tpu_custom_call.1
= control target key start
LH: loop header
LB: loop body
LE: loop exit
PB: predicated region body
PF: predicated region fallthrough
CT: control target
= control target key end

     0   :  { %v138_v0 = vmov 0   ;;  %v139_v2 = vmov 2   ;;  %v140_v3 = vmov 1   ;;  %v141_v4 = vmov 3   ;;  %s193_s0 = inlined_call_operand.vmem [shape: f32[1,8,4], index: 0, kind: input, shape index: {}]   ;;  %s194_s1 = inlined_call_operand.vmem [shape: f32[4,128], index: 1, kind: input, shape index: {}]   ;;  %s195_s2 = inlined_call_operand.vmem [shape: f32[1,128], index: 2, kind: input, shape index: {}]   ;;  %s196_s3 = inlined_call_operand.vmem [shape: f32[2,128], index: 3, kind: input, shape index: {}]   ;;  %s197_s4 = inlined_call_operand.vmem [shape: f32[1,2], index: 4, kind: input, shape index: {}]   ;;  %s198_s5 = inlined_call_operand.vmem [shape: f32[1,8,2], index: 5, kind: output, shape index: {}]  }
   0x1   :  { %129 = vset.pattern.permute.xlu0 %v138_v0  ;;  %v20_v1 = vld [vmem:[%s193_s0] sm:$0xff]  ;;  %131 = vset.pattern.permute.xlu1 %v139_v2  ;;  %v27_v5 = vlaneseq  ;;  %vm98_vm1 = vcmask 15360  }
   0x2   :  { %24 = vperm.xlu0 %129, %v20_v1   ;;  %43 = vperm.xlu1 %131, %v20_v1   ;;  %v21_v9 = vld [vmem:[%s194_s1] sm:$0xf] }
   0x3   :  { %v28_v6 = vshrl.u32 %v27_v5, 7  ;;  %v123_v26 = vld [vmem:[%s195_s2] ss:$0 sm:$0xff]  ;;  %v87_v35 = vand.u32 127, %v27_v5 }
   0x4   :  { %v71_v27 = vld [vmem:[%s196_s3] sm:$0x3] }
   0x5   :  { %v29_v7 = vsub.s32 0, %v28_v6  ;;  %v38_v8 = vsub.s32 1, %v28_v6  ;;  %v48_v11 = vsub.s32 2, %v28_v6  ;;  %v58_v13 = vsub.s32 3, %v28_v6  ;;  %v124_v36 = vld [vmem:[%s197_s4] ss:$0 sm:$0xff] }
   0x6   :  { %130 = vset.pattern.permute.xlu0 %v140_v3  ;;  %132 = vset.pattern.permute.xlu1 %v141_v4  ;;  %vm88_vm0 = vcmp.eq.s32.totalorder %v87_v35, 0 }
   0x7   :  { %33 = vperm.xlu0 %130, %v20_v1   ;;  %53 = vperm.xlu1 %132, %v20_v1   ;;  %v30_v14 = vrot.slane %v21_v9, %v29_v7  ;;  %v39_v15 = vrot.slane %v21_v9, %v38_v8  ;;  %v49_v16 = vrot.slane %v21_v9, %v48_v11 }
   0x8   :  { %v59_v17 = vrot.slane %v21_v9, %v58_v13  ;;  %v82_v30 = vrot.slane %v71_v27, %v38_v8  ;;  %v75_v31 = vrot.slane %v71_v27, %v29_v7 }
   0xb   :  { %133 = vset.pattern.permute.xlu0 %v141_v4 }
  0x81   :  { %v25_v10 = vpop.permute.xlu0 %24  ;;  %v44_v12 = vpop.permute.xlu1 %43 }
  0x82   :  { %v31_v20 = vmul.f32 %v30_v14, %v25_v10  ;;  %v50_v22 = vmul.f32 %v49_v16, %v44_v12 }
  0x86   :  { %v34_v18 = vpop.permute.xlu0 %33  ;;  %v54_v19 = vpop.permute.xlu1 %53 }
  0x87   :  { %v40_v21 = vmul.f32 %v39_v15, %v34_v18  ;;  %v60_v24 = vmul.f32 %v59_v17, %v54_v19 }
  0x89   :  { %v41_v23 = vadd.f32 %v40_v21, %v31_v20 }
  0x8b   :  { %v51_v25 = vadd.f32 %v50_v22, %v41_v23 }
  0x8d   :  { %v61_v28 = vadd.f32 %v60_v24, %v51_v25 }
  0x8f   :  { %v69_v29 = vadd.f32 %v123_v26, %v61_v28 }
  0x91   :  { %v70_v32 = vmax.f32 %v69_v29, 0.0 }
  0x93   :  { %v83_v33 = vmul.f32 %v82_v30, %v70_v32  ;;  %v76_v34 = vmul.f32 %v75_v31, %v70_v32 }
  0x95   :  { %84 = vadd.xlane.f32.xlu0 %v83_v33  ;;  %77 = vadd.xlane.f32.xlu1 %v76_v34 }
 0x122   :  { %v85_v37 = vpop.xlane.xlu0 %84  ;;  %v78_v38 = vpop.xlane.xlu1 %77 }
 0x123   :  { %v89_v39 = vsel %vm88_vm0, %v78_v38, %v85_v37 }
 0x124   :  { %v97_v40 = vadd.f32 %v124_v36, %v89_v39 }
 0x126   :  { %v99_v41 = vsel %vm98_vm1, %v97_v40, -inf }
 0x127   :  { %v100_v42 = vrot.slane %v99_v41, 4 }
 0x129   :  { %v101_v43 = vmax.f32 %v99_v41, %v100_v42 }
 0x12b   :  { %v102_v44 = vrot.slane %v101_v43, 2 }
 0x12d   :  { %v103_v45 = vmax.f32 %v101_v43, %v102_v44 }
 0x12f   :  { %v104_v46 = vrot.slane %v103_v45, 1 }
 0x131   :  { %v105_v47 = vmax.f32 %v103_v45, %v104_v46 }
 0x133   :  { %v106_v48 = vsub.f32 %v97_v40, %v105_v47 }
 0x135   :  { %v107_v49 = vmul.f32 1.442695, %v106_v48 }
 0x137   :  { %134 = vpow2.f32 %v107_v49 }
 0x141   :  { %v135_v50 = vpop.eup %134 }
 0x142   :  { %v109_v51 = vsel %vm98_vm1, %v135_v50, 0.0 }
 0x143   :  { %v110_v52 = vrot.slane %v109_v51, 4 }
 0x145   :  { %v111_v53 = vadd.f32 %v110_v52, %v109_v51 }
 0x147   :  { %v112_v54 = vrot.slane %v111_v53, 2 }
 0x149   :  { %v113_v55 = vadd.f32 %v112_v54, %v111_v53 }
 0x14b   :  { %v114_v56 = vrot.slane %v113_v55, 1 }
 0x14d   :  { %v115_v57 = vadd.f32 %v114_v56, %v113_v55 }
 0x14f   :  { %136 = vrcp.f32 %v115_v57 }
 0x159   :  { %v137_v58 = vpop.eup %136 }
 0x15a   :  { %v117_v59 = vmul.f32 %v137_v58, %v135_v50 }
 0x15c   :  { %118 = vst.msk [vmem:[%s198_s5] sm:$0xff] %vm98_vm1, %v117_v59 }

</bundles_post_ra>
